<compile_context>
chip_gen: v5e
topology: v5e:2x2
jax: 0.10.0
libtpu: 0.0.40
codegen_flags: <defaults>
</compile_context>

<pallas_src>
import functools

import jax
import jax.numpy as jnp
from jax import lax
from jax.experimental import pallas as pl
from jax.experimental.pallas import tpu as pltpu


def _round_up(x, m):
    return (x + m - 1) // m * m


def _hybrid_ce_tile_kernel(local_ref, global_ref, tgt_ref, out_ref, *,
                           tile_b, batch):
    """Per-tile partial CE sums for both logit streams.

    local_ref / global_ref : [tile_b, C] logits (native dtype)
    tgt_ref                : [tile_b, 1] int32 class indices
    out_ref                : [1, 8, 128] f32; sublanes 0..3 splat the local
                             partial sum, 4..7 the global partial sum.
    """
    tile_idx = pl.program_id(0)
    tgt = tgt_ref[...]                                             # [tile_b, 1]

    # Valid-row mask: padded tail rows (global row >= batch) contribute 0.
    row_in_tile = lax.broadcasted_iota(jnp.int32, (tile_b, 1), 0)
    valid = (tile_idx * tile_b + row_in_tile) < batch              # [tile_b, 1]

    def ce_partial_sum(logits_ref):
        # Single explicit upcast per tile (important on v5e: no bf16 VPU/EUP).
        x = logits_ref[...].astype(jnp.float32)                    # [tile_b, C]
        m = jnp.max(x, axis=-1, keepdims=True)                     # [tile_b, 1]
        lse = jnp.log(jnp.sum(jnp.exp(x - m), axis=-1,
                              keepdims=True)) + m                  # [tile_b, 1]
        cls = lax.broadcasted_iota(jnp.int32, x.shape, 1)          # [tile_b, C]
        picked = jnp.sum(jnp.where(cls == tgt, x, 0.0),
                         axis=-1, keepdims=True)                   # [tile_b, 1]
        per_sample = jnp.where(valid, lse - picked, 0.0)           # [tile_b, 1]
        return jnp.sum(per_sample)                                 # scalar

    local_sum = ce_partial_sum(local_ref)
    global_sum = ce_partial_sum(global_ref)

    # Lane-dense, full (8,128) unmasked store: rows 0..3 local, 4..7 global.
    row = lax.broadcasted_iota(jnp.int32, out_ref.shape, 1)
    out_ref[...] = jnp.where(row < 4, local_sum, global_sum).astype(out_ref.dtype)


def _choose_tile_b(b_pad8, c, itemsize, *, vmem_budget_bytes=40 * 1024 * 1024,
                   cap=1024):
    """Largest batch tile (multiple of 8) whose streamed blocks fit the budget.

    Budget models: 2 logit inputs x 2 pipeline buffers x tile_b x C x itemsize
    (+ targets, which are negligible).
    """
    bytes_per_row = 4 * c * itemsize + 2 * 4
    tile = vmem_budget_bytes // max(bytes_per_row, 1)
    tile = min(tile, cap, b_pad8)
    return max(8, (tile // 8) * 8)


def _reference_ce(logits, target):
    logits = logits.astype(jnp.float32)
    lse = jax.nn.logsumexp(logits, axis=-1)
    picked = jnp.take_along_axis(logits, target[:, None].astype(jnp.int32),
                                 axis=-1)[:, 0]
    return jnp.mean(lse - picked)


def _hybrid_loss_xla(local_logits, global_logits, target, alpha):
    local_loss = _reference_ce(local_logits, target)
    global_loss = _reference_ce(global_logits, target)
    return alpha * local_loss + (1.0 - alpha) * global_loss, local_loss, global_loss


def hybrid_loss(local_logits, global_logits, target, alpha=0.5, *,
                use_pallas=None, max_tile_b=None):
    """Pallas equivalent of HybridLoss.forward.

    Returns (alpha*local + (1-alpha)*global, local_loss, global_loss).
    """
    B, C = local_logits.shape
    assert global_logits.shape == (B, C)
    alpha = float(alpha)

    if use_pallas is None:
        # Below ~1 MiB of logits the custom-call + per-step overhead dominates;
        # let fused XLA handle it.
        use_pallas = 2 * B * C * local_logits.dtype.itemsize >= (1 << 20)
    if not use_pallas:
        return _hybrid_loss_xla(local_logits, global_logits, target, alpha)

    itemsize = local_logits.dtype.itemsize
    b_pad8 = _round_up(B, 8)
    tile_b = _choose_tile_b(b_pad8, C, itemsize)
    if max_tile_b is not None:
        tile_b = max(8, min(tile_b, (int(max_tile_b) // 8) * 8))
    b_pad = _round_up(B, tile_b)
    num_tiles = b_pad // tile_b

    tgt2d = target.astype(jnp.int32).reshape(B, 1)
    if b_pad > B:
        pad = b_pad - B
        # Padded rows are masked out inside the kernel (global row >= B).
        local_logits = jnp.pad(local_logits, ((0, pad), (0, 0)))
        global_logits = jnp.pad(global_logits, ((0, pad), (0, 0)))
        tgt2d = jnp.pad(tgt2d, ((0, pad), (0, 0)))

    kernel = functools.partial(_hybrid_ce_tile_kernel, tile_b=tile_b, batch=B)

    out = pl.pallas_call(
        kernel,
        out_shape=jax.ShapeDtypeStruct((num_tiles, 8, 128), jnp.float32),
        grid=(num_tiles,),
        in_specs=[
            pl.BlockSpec((tile_b, C), lambda i: (i, 0)),
            pl.BlockSpec((tile_b, C), lambda i: (i, 0)),
            pl.BlockSpec((tile_b, 1), lambda i: (i, 0)),
        ],
        out_specs=pl.BlockSpec((1, 8, 128), lambda i: (i, 0, 0)),
        compiler_params=pltpu.CompilerParams(
            dimension_semantics=("parallel",),      # megacore on v7x; no-op v5e/v6e
            vmem_limit_bytes=48 * 1024 * 1024,      # > scoped defaults, < v7x 64 MiB
        ),
    )(local_logits, global_logits, tgt2d)

    inv_b = 1.0 / float(B)
    local_loss = jnp.sum(out[:, 0, 0]) * inv_b
    global_loss = jnp.sum(out[:, 4, 0]) * inv_b
    combined = alpha * local_loss + (1.0 - alpha) * global_loss
    return combined, local_loss, global_loss


if __name__ == "__main__":
    B, C = 37, 10          # deliberately not a multiple of 8 -> exercises padding mask
    alpha = 0.5            # HybridLoss(alpha=0.5)

    key = jax.random.PRNGKey(0)
    k1, k2, k3 = jax.random.split(key, 3)
    local_logits = jax.random.normal(k1, (B, C), dtype=jnp.float32)
    global_logits = jax.random.normal(k2, (B, C), dtype=jnp.float32)
    target = jax.random.randint(k3, (B,), 0, C, dtype=jnp.int32)

    # Force the Pallas path at this small demo size and cap the tile so the
    # grid has several steps (exercises tiling + parallel semantics + mask).
    combined, local_loss, global_loss = hybrid_loss(
        local_logits, global_logits, target, alpha=alpha,
        use_pallas=True, max_tile_b=16,
    )
    jax.block_until_ready((combined, local_loss, global_loss))

    ref_local = _reference_ce(local_logits, target)
    ref_global = _reference_ce(global_logits, target)
    ref_combined = alpha * ref_local + (1 - alpha) * ref_global

    assert jnp.allclose(local_loss, ref_local, atol=1e-5), (local_loss, ref_local)
    assert jnp.allclose(global_loss, ref_global, atol=1e-5), (global_loss, ref_global)
    assert jnp.allclose(combined, ref_combined, atol=1e-5), (combined, ref_combined)

    # Also check native bf16 streaming (no wrapper-side f32 cast).
    lb, gb = local_logits.astype(jnp.bfloat16), global_logits.astype(jnp.bfloat16)
    c_b, l_b, g_b = hybrid_loss(lb, gb, target, alpha=alpha,
                                use_pallas=True, max_tile_b=16)
    jax.block_until_ready((c_b, l_b, g_b))
    ref_l_b = _reference_ce(lb, target)
    ref_g_b = _reference_ce(gb, target)
    ref_c_b = alpha * ref_l_b + (1 - alpha) * ref_g_b
    assert jnp.allclose(l_b, ref_l_b, atol=1e-5), (l_b, ref_l_b)
    assert jnp.allclose(g_b, ref_g_b, atol=1e-5), (g_b, ref_g_b)
    assert jnp.allclose(c_b, ref_c_b, atol=1e-5), (c_b, ref_c_b)

    print("KERNEL_OK")
</pallas_src>

<mosaic_0001>
module attributes {stable_mosaic.version = 11 : i64} {
  func.func @_hybrid_ce_tile_kernel(%arg0: i32, %arg1: memref<16x10xf32, #tpu.memory_space<vmem>>, %arg2: memref<16x10xf32, #tpu.memory_space<vmem>>, %arg3: memref<16x1xi32, #tpu.memory_space<vmem>>, %arg4: memref<1x8x128xf32, #tpu.memory_space<vmem>>) attributes {dimension_semantics = [#tpu.dimension_semantics<parallel>], iteration_bounds = array<i64: 3>, scalar_prefetch = 0 : i64, scratch_operands = 0 : i64, tpu.core_type = #tpu.core_type<tc>, window_params = [{transform_indices = @transform_0, window_bounds = array<i64: 16, 10>}, {transform_indices = @transform_1, window_bounds = array<i64: 16, 10>}, {transform_indices = @transform_2, window_bounds = array<i64: 16, 1>}, {transform_indices = @transform_3, window_bounds = array<i64: 1, 8, 128>}]} {
    %c0 = arith.constant 0 : index
    %c0_0 = arith.constant 0 : index
    %0 = vector.load %arg3[%c0, %c0_0] : memref<16x1xi32, #tpu.memory_space<vmem>>, vector<16x1xi32>
    %1 = tpu.iota {dimensions = array<i32: 0>} : vector<16x1xi32>
    %c16_i32 = arith.constant 16 : i32
    %2 = arith.muli %arg0, %c16_i32 : i32
    %3 = vector.broadcast %2 : i32 to vector<16x1xi32>
    %4 = arith.addi %3, %1 : vector<16x1xi32>
    %c37_i32 = arith.constant 37 : i32
    %5 = vector.broadcast %c37_i32 : i32 to vector<16x1xi32>
    %6 = arith.cmpi slt, %4, %5 : vector<16x1xi32>
    %c0_1 = arith.constant 0 : index
    %c0_2 = arith.constant 0 : index
    %7 = vector.load %arg1[%c0_1, %c0_2] : memref<16x10xf32, #tpu.memory_space<vmem>>, vector<16x10xf32>
    %cst = arith.constant dense<0xFF800000> : vector<16xf32>
    %8 = vector.multi_reduction <maximumf>, %7, %cst [1] : vector<16x10xf32> to vector<16xf32>
    %9 = vector.shape_cast %8 : vector<16xf32> to vector<16x1xf32>
    %10 = vector.broadcast %9 : vector<16x1xf32> to vector<16x10xf32>
    %11 = arith.subf %7, %10 : vector<16x10xf32>
    %12 = math.exp %11 : vector<16x10xf32>
    %cst_3 = arith.constant dense<0.000000e+00> : vector<16xf32>
    %13 = vector.multi_reduction <add>, %12, %cst_3 [1] : vector<16x10xf32> to vector<16xf32>
    %14 = vector.shape_cast %13 : vector<16xf32> to vector<16x1xf32>
    %15 = math.log %14 : vector<16x1xf32>
    %16 = arith.addf %15, %9 : vector<16x1xf32>
    %17 = tpu.iota {dimensions = array<i32: 1>} : vector<16x10xi32>
    %18 = vector.broadcast %0 : vector<16x1xi32> to vector<16x10xi32>
    %19 = arith.cmpi eq, %17, %18 : vector<16x10xi32>
    %cst_4 = arith.constant 0.000000e+00 : f32
    %20 = vector.broadcast %cst_4 : f32 to vector<16x10xf32>
    %21 = arith.select %19, %7, %20 : vector<16x10xi1>, vector<16x10xf32>
    %cst_5 = arith.constant dense<0.000000e+00> : vector<16xf32>
    %22 = vector.multi_reduction <add>, %21, %cst_5 [1] : vector<16x10xf32> to vector<16xf32>
    %23 = vector.shape_cast %22 : vector<16xf32> to vector<16x1xf32>
    %24 = arith.subf %16, %23 : vector<16x1xf32>
    %cst_6 = arith.constant 0.000000e+00 : f32
    %25 = vector.broadcast %cst_6 : f32 to vector<16x1xf32>
    %26 = arith.select %6, %24, %25 : vector<16x1xi1>, vector<16x1xf32>
    %27 = vector.shape_cast %26 : vector<16x1xf32> to vector<1x16x1xf32>
    %cst_7 = arith.constant dense<0.000000e+00> : vector<1xf32>
    %28 = vector.multi_reduction <add>, %27, %cst_7 [1, 2] : vector<1x16x1xf32> to vector<1xf32>
    %29 = vector.shape_cast %28 : vector<1xf32> to vector<1x1x1xf32>
    %30 = vector.extract %29[0, 0, 0] : f32 from vector<1x1x1xf32>
    %c0_8 = arith.constant 0 : index
    %c0_9 = arith.constant 0 : index
    %31 = vector.load %arg2[%c0_8, %c0_9] : memref<16x10xf32, #tpu.memory_space<vmem>>, vector<16x10xf32>
    %cst_10 = arith.constant dense<0xFF800000> : vector<16xf32>
    %32 = vector.multi_reduction <maximumf>, %31, %cst_10 [1] : vector<16x10xf32> to vector<16xf32>
    %33 = vector.shape_cast %32 : vector<16xf32> to vector<16x1xf32>
    %34 = vector.broadcast %33 : vector<16x1xf32> to vector<16x10xf32>
    %35 = arith.subf %31, %34 : vector<16x10xf32>
    %36 = math.exp %35 : vector<16x10xf32>
    %cst_11 = arith.constant dense<0.000000e+00> : vector<16xf32>
    %37 = vector.multi_reduction <add>, %36, %cst_11 [1] : vector<16x10xf32> to vector<16xf32>
    %38 = vector.shape_cast %37 : vector<16xf32> to vector<16x1xf32>
    %39 = math.log %38 : vector<16x1xf32>
    %40 = arith.addf %39, %33 : vector<16x1xf32>
    %41 = tpu.iota {dimensions = array<i32: 1>} : vector<16x10xi32>
    %42 = vector.broadcast %0 : vector<16x1xi32> to vector<16x10xi32>
    %43 = arith.cmpi eq, %41, %42 : vector<16x10xi32>
    %cst_12 = arith.constant 0.000000e+00 : f32
    %44 = vector.broadcast %cst_12 : f32 to vector<16x10xf32>
    %45 = arith.select %43, %31, %44 : vector<16x10xi1>, vector<16x10xf32>
    %cst_13 = arith.constant dense<0.000000e+00> : vector<16xf32>
    %46 = vector.multi_reduction <add>, %45, %cst_13 [1] : vector<16x10xf32> to vector<16xf32>
    %47 = vector.shape_cast %46 : vector<16xf32> to vector<16x1xf32>
    %48 = arith.subf %40, %47 : vector<16x1xf32>
    %cst_14 = arith.constant 0.000000e+00 : f32
    %49 = vector.broadcast %cst_14 : f32 to vector<16x1xf32>
    %50 = arith.select %6, %48, %49 : vector<16x1xi1>, vector<16x1xf32>
    %51 = vector.shape_cast %50 : vector<16x1xf32> to vector<1x16x1xf32>
    %cst_15 = arith.constant dense<0.000000e+00> : vector<1xf32>
    %52 = vector.multi_reduction <add>, %51, %cst_15 [1, 2] : vector<1x16x1xf32> to vector<1xf32>
    %53 = vector.shape_cast %52 : vector<1xf32> to vector<1x1x1xf32>
    %54 = vector.extract %53[0, 0, 0] : f32 from vector<1x1x1xf32>
    %55 = tpu.iota {dimensions = array<i32: 1>} : vector<1x8x128xi32>
    %c4_i32 = arith.constant 4 : i32
    %56 = vector.broadcast %c4_i32 : i32 to vector<1x8x128xi32>
    %57 = arith.cmpi slt, %55, %56 : vector<1x8x128xi32>
    %58 = vector.broadcast %30 : f32 to vector<1x8x128xf32>
    %59 = vector.broadcast %54 : f32 to vector<1x8x128xf32>
    %60 = arith.select %57, %58, %59 : vector<1x8x128xi1>, vector<1x8x128xf32>
    %c0_16 = arith.constant 0 : index
    %c0_17 = arith.constant 0 : index
    %c0_18 = arith.constant 0 : index
    %61 = vector.load %arg4[%c0_16, %c0_17, %c0_18] : memref<1x8x128xf32, #tpu.memory_space<vmem>>, vector<1x8x128xf32>
    tpu.vector_store %arg4[%c0_16, %c0_17, %c0_18], %60 {strides = array<i32>} : memref<1x8x128xf32, #tpu.memory_space<vmem>>, vector<1x8x128xf32>,
    return
  }
  func.func @transform_0(%arg0: i32) -> (i32, i32) {
    %c0_i32 = arith.constant 0 : i32
    %c0_i32_0 = arith.constant 0 : i32
    return %arg0, %c0_i32 : i32, i32
  }
  func.func @transform_1(%arg0: i32) -> (i32, i32) {
    %c0_i32 = arith.constant 0 : i32
    %c0_i32_0 = arith.constant 0 : i32
    return %arg0, %c0_i32 : i32, i32
  }
  func.func @transform_2(%arg0: i32) -> (i32, i32) {
    %c0_i32 = arith.constant 0 : i32
    %c0_i32_0 = arith.constant 0 : i32
    return %arg0, %c0_i32 : i32, i32
  }
  func.func @transform_3(%arg0: i32) -> (i32, i32, i32) {
    %c0_i32 = arith.constant 0 : i32
    %c0_i32_0 = arith.constant 0 : i32
    %c0_i32_1 = arith.constant 0 : i32
    return %arg0, %c0_i32, %c0_i32_0 : i32, i32, i32
  }
}

</mosaic_0001>

<bundles_post_ra>
// kernel: tpu_custom_call.1
= control target key start
LH: loop header
LB: loop body
LE: loop exit
PB: predicated region body
PF: predicated region fallthrough
CT: control target
= control target key end

     0   :  { %8 = vsyncpa [#allocation3], 0  ;;  %s725_s0 = inlined_call_operand.vmem [shape: f32[48,10], index: 0, kind: input, shape index: {}]   ;;  %s726_s1 = inlined_call_operand.vmem [shape: f32[48,10], index: 1, kind: input, shape index: {}]   ;;  %s727_s2 = inlined_call_operand.vmem [shape: s32[48,1], index: 2, kind: input, shape index: {}]   ;;  %s728_s3 = inlined_call_operand.hbm [shape: f32[3,8,128], index: 3, kind: output, shape index: {}]  }
   0x1   :  { %10 = vsyncpa [#allocation3 + $0x1], 0  ;;  %s605_s12 = smov 0   ;;  %s607_s13 = smov 0  }
   0x2   :  { %s609_s14 = smov 0   ;;  %s611_s15 = smov 0  }
   0x3 LB: > { %s626_s16 = sadd.s32 4294967295, %s582_s15   ;;  %s442_s17 = sadd.s32 4294967294, %s582_s15   ;;  %s582_s15 = sphi %s611_s15, %s734_s15   ;;  %s578_s14 = sphi %s609_s14, %s733_s14   ;;  %s574_s13 = sphi %s607_s13, %s732_s13   ;;  %s570_s12 = sphi %s605_s12, %s731_s12  }
   0x4   : > { %s630_s18 = sadd.s32 1, %s582_s15   ;;  %s101_s19 = sadd.s32 1, %s578_s14 }
   0x5   : > { %s98_s20 = ssub.s32 %s582_s15, %s630_s18  ;;  %p111_p0 = scmp.ne.s32.totalorder %s578_s14, %s574_s13 }
   0x6   : > { %p99_p1 = scmp.eq.s32.totalorder %s98_s20, 0  ;;  %p112_p2 = scmp.eq.s32.totalorder %s626_s16, 2 }
   0x7   : > { %p117_p3 = scmp.ne.s32.totalorder %s574_s13, %s570_s12  ;;  %p118_p4 = scmp.eq.s32.totalorder %s442_s17, 2 }
   0x8   : > { %s641_s21 = scalar_select %p99_p1, %s578_s14, %s101_s19  }
   0x9   : > { %p643_p5 = por %p112_p2, %p111_p0  ;;  %p647_p6 = por %p118_p4, %p117_p3 }
   0xa   : > { %p445_p7 = scmp.ge.s32.totalorder %s582_s15, 1  ;;  %p163_p8 = scmp.lt.s32.totalorder %s582_s15, 4 }
   0xc   : > { %p164_p9 = pnand %p445_p7, %p163_p8 }
   0xd   : > { %s447_s24 = sshll.u32 (!%p164_p9), %s626_s16, 1  ;;  %s453_s8 = sshll.u32 (!%p164_p9), %s626_s16, 4 }
   0xe   : > { %167 = sbr.rel (%p164_p9) target bundleno = 483 (0x1e3), region = 32  ;;  %p198_p10 = scmp.lt.s32.totalorder (!%p164_p9), %s447_s24, 5 }
   0xf   : > { %s194_s9 = sand.u32 (!%p164_p9), 1, %s574_s13   ;;  %s455_s11 = sshll.u32 (!%p164_p9), %s626_s16, 3 }
  0x10   : > { %s446_s10 = sshll.u32 (!%p164_p9), %s194_s9, 3  ;;  %s354_s20 = scalar_lea.hbm (!%p164_p9), %s728_s3, %s455_s11 }
  0x11   : > { %s358_s27 = sshll.u32 (!%p164_p9), %s354_s20, 4  ;;  %s344_s29 = scalar_lea.sflag (!%p164_p9), [#allocation3], %s194_s9  ;;  %s359_s27 = int_to_ptr.hbm [resolvable:$true] %s358_s27 }
  0x12   : > { %s534_s16 = sshra.s32 (!%p164_p9), %s359_s27, 4  ;;  %s540_s6 = scalar_lea.hbm (!%p164_p9), %s728_s3, 24  ;;  %s535_s16 = int_to_ptr.hbm [resolvable:$true] %s534_s16 }
  0x13   : > { %v584_v0 = vmov 0   ;;  %s736_s24 = smov (!%p198_p10, %s447_s24), 5  ;;  %vm228_vm0 = vcmask 80896   ;;  %v217_v28 = vlaneseq  ;;  %v221_v49 = vstv %s453_s8  ;;  %s536_s30 = scalar_lea.hbm %s535_s16, 8 }
  0x14   : > { %502 = vset.pattern.permute.xlu2 %v584_v0  ;;  %503 = vset.pattern.permute.xlu0 %v584_v0  ;;  %s448_s25 = sshll.u32 %s736_s24, 3  ;;  %vm275_vm5 = vcmask 7168   ;;  %s196_s24 = scalar_lea.vmem [#allocation2], %s446_s10 }
  0x15   : > { %s207_s28 = scalar_lea.vmem %s726_s1, %s448_s25  ;;  %s201_s4 = scalar_lea.vmem %s725_s0, %s448_s25  ;;  %v254_v30 = vand.u32 127, %v217_v28  ;;  %v681_v45 = vshrl.u32 %v217_v28, 7 }
  0x16   : > { %v288_v1 = vld [vmem:[%s207_s28] sm:$0xff]  ;;  %s213_s7 = scalar_lea.vmem %s727_s2, %s448_s25  ;;  %v289_v6 = vld [vmem:[%s207_s28 + $0x8] sm:$0xff]  ;;  %s356_s25 = sshll.u32 %s196_s24, 4  ;;  %s357_s25 = int_to_ptr.vmem [resolvable:$true] %s356_s25 }
  0x17   : > { %v226_v2 = vld [vmem:[%s201_s4] sm:$0xff]  ;;  %v290_v3 = vsel %vm228_vm0, %v288_v1, -inf  ;;  %v227_v7 = vld [vmem:[%s201_s4 + $0x8] sm:$0xff]  ;;  %v293_v8 = vsel %vm228_vm0, %v289_v6, -inf  ;;  %v219_v51 = vadd.s32 8, %v681_v45  ;;  %v222_v52 = vadd.s32 %v221_v49, %v681_v45  ;;  %p537_p11 = scmp.ne.s32.totalorder %s535_s16, %s536_s30  ;;  %p541_p0 = scmp.lt.s32.totalorder %s535_s16, %s728_s3 }
  0x18   : > { %v229_v4 = vsel %vm228_vm0, %v226_v2, -inf  ;;  %v215_v5 = vld [vmem:[%s213_s7] sm:$0xff]  ;;  %291 = vmax.xlane.f32.xlu1 %v290_v3  ;;  %v232_v9 = vsel %vm228_vm0, %v227_v7, -inf  ;;  %v216_v10 = vld [vmem:[%s213_s7 + $0x8] sm:$0xff]  ;;  %vm338_vm6 = vcmp.lt.s32.totalorder %v681_v45, 4  ;;  %p542_p1 = scmp.lt.s32.totalorder %s540_s6, %s536_s30 }
  0x19   : > { %230 = vmax.xlane.f32.xlu0 %v229_v4  ;;  %256 = vperm.xlu2 %502, %v215_v5   ;;  %v223_v56 = vadd.s32 %v221_v49, %v219_v51  ;;  %vm224_vm3 = vcmp.lt.s32.totalorder %v222_v52, 37  ;;  %p538_p12 = pnand %p537_p11, %p643_p5 }
  0x1a   : > { %p543_p2 = por %p542_p1, %p541_p0 }
  0x1b   : > { %vm225_vm4 = vcmp.lt.s32.totalorder %v223_v56, 37  ;;  %p539_p13 = pneg %p538_p12 }
  0x1d   : > { %p544_p3 = pnand %p543_p2, %p539_p13 }
  0x20   : > { %294 = vmax.xlane.f32.xlu1 %v293_v8 }
  0x21   : > { %233 = vmax.xlane.f32.xlu0 %v232_v9  ;;  %259 = vperm.xlu2 %502, %v216_v10  }
  0x73   : > { %v257_v21 = vpop.permute.xlu2 %256 }
  0x74   : > { %vm261_vm1 = vcmp.eq.s32.totalorder %v254_v30, %v257_v21 }
  0x75   : > { %v263_v36 = vsel %vm261_vm1, %v226_v2, 0.0  ;;  %v314_v40 = vsel %vm261_vm1, %v288_v1, 0.0 }
  0x76   : > { %v265_v38 = vsel %vm228_vm0, %v263_v36, 0.0  ;;  %v316_v42 = vsel %vm228_vm0, %v314_v40, 0.0 }
  0x7b   : > { %v260_v32 = vpop.permute.xlu2 %259 }
  0x7c   : > { %vm262_vm2 = vcmp.eq.s32.totalorder %v254_v30, %v260_v32 }
  0x7d   : > { %v264_v35 = vsel %vm262_vm2, %v227_v7, 0.0  ;;  %v315_v39 = vsel %vm262_vm2, %v289_v6, 0.0 }
  0x7e   : > { %v268_v37 = vsel %vm228_vm0, %v264_v35, 0.0  ;;  %v319_v41 = vsel %vm228_vm0, %v315_v39, 0.0 }
  0x8b   : > { %v667_v11 = vpop.xlane.xlu1 %291 }
  0x8c   : > { %v231_v12 = vpop.xlane.xlu0 %230  ;;  %v296_v13 = vsub.f32 %v288_v1, %v667_v11 }
  0x8d   : > { %v235_v14 = vsub.f32 %v226_v2, %v231_v12 }
  0x8e   : > { %v298_v15 = vmul.f32 1.442695, %v296_v13 }
  0x8f   : > { %v237_v16 = vmul.f32 1.442695, %v235_v14 }
  0x90   : > { %504 = vpow2.f32 %v298_v15 }
  0x91   : > { %506 = vpow2.f32 %v237_v16 }
  0x93   : > { %v670_v17 = vpop.xlane.xlu1 %294 }
  0x94   : > { %v234_v18 = vpop.xlane.xlu0 %233  ;;  %v297_v19 = vsub.f32 %v289_v6, %v670_v17 }
  0x95   : > { %v236_v20 = vsub.f32 %v227_v7, %v234_v18 }
  0x96   : > { %v505_v22 = vpop.eup %504  ;;  %v300_v23 = vmul.f32 1.442695, %v297_v19 }
  0x97   : > { %v239_v24 = vmul.f32 1.442695, %v236_v20  ;;  %v507_v25 = vpop.eup %506  ;;  %v302_v26 = vsel %vm228_vm0, %v505_v22, 0.0 }
  0x98   : > { %508 = vpow2.f32 %v300_v23  ;;  %303 = vadd.xlane.f32.xlu2 %v302_v26  ;;  %v241_v27 = vsel %vm228_vm0, %v507_v25, 0.0 }
  0x99   : > { %510 = vpow2.f32 %v239_v24  ;;  %242 = vadd.xlane.f32.xlu0 %v241_v27 }
  0x9e   : > { %v509_v29 = vpop.eup %508 }
  0x9f   : > { %v511_v31 = vpop.eup %510  ;;  %v305_v33 = vsel %vm228_vm0, %v509_v29, 0.0 }
  0xa0   : > { %v244_v34 = vsel %vm228_vm0, %v511_v31, 0.0 }
  0xa1   : > { %306 = vadd.xlane.f32.xlu0 %v305_v33  ;;  %245 = vadd.xlane.f32.xlu1 %v244_v34 }
  0xa9   : > { %269 = vadd.xlane.f32.xlu0 %v268_v37  ;;  %266 = vadd.xlane.f32.xlu1 %v265_v38 }
  0xb1   : > { %320 = vadd.xlane.f32.xlu0 %v319_v41  ;;  %317 = vadd.xlane.f32.xlu1 %v316_v42 }
 0x10b   : > { %v304_v44 = vpop.xlane.xlu2 %303 }
 0x10c   : > { %v243_v43 = vpop.xlane.xlu0 %242 }
 0x10d   : > { %512 = vlog2.f32 %v243_v43 }
 0x10e   : > { %514 = vlog2.f32 %v304_v44 }
 0x113   : > { %v513_v46 = vpop.eup %512 }
 0x114   : > { %v246_v47 = vpop.xlane.xlu1 %245  ;;  %v307_v48 = vpop.xlane.xlu0 %306  ;;  %v248_v50 = vmul.f32 0.6931472, %v513_v46 }
 0x115   : > { %516 = vlog2.f32 %v246_v47  ;;  %v515_v53 = vpop.eup %514 }
 0x116   : > { %518 = vlog2.f32 %v307_v48  ;;  %v251_v55 = vadd.f32 %v248_v50, %v231_v12  ;;  %v309_v63 = vmul.f32 0.6931472, %v515_v53 }
 0x118   : > { %v312_v4 = vadd.f32 %v309_v63, %v667_v11 }
 0x11b   : > { %v517_v54 = vpop.eup %516 }
 0x11c   : > { %v519_v57 = vpop.eup %518  ;;  %v250_v58 = vmul.f32 0.6931472, %v517_v54  ;;  %v267_v59 = vpop.xlane.xlu1 %266 }
 0x11d   : > { %v270_v60 = vpop.xlane.xlu0 %269  ;;  %v271_v61 = vsub.f32 %v251_v55, %v267_v59  ;;  %v311_v0 = vmul.f32 0.6931472, %v519_v57 }
 0x11e   : > { %v252_v62 = vadd.f32 %v250_v58, %v234_v18 }
 0x11f   : > { %v273_v1 = vsel %vm224_vm3, %v271_v61, 0.0  ;;  %v313_v5 = vadd.f32 %v311_v0, %v670_v17 }
 0x120   : > { %v272_v2 = vsub.f32 %v252_v62, %v270_v60  ;;  %v276_v6 = vsel %vm275_vm5, %v273_v1, 0.0 }
 0x122   : > { %v274_v3 = vsel %vm225_vm4, %v272_v2, 0.0 }
 0x123   : > { %v277_v7 = vsel %vm275_vm5, %v274_v3, 0.0 }
 0x124   : > { %v318_v8 = vpop.xlane.xlu1 %317  ;;  %v278_v10 = vadd.f32 %v277_v7, %v276_v6 }
 0x125   : > { %v321_v9 = vpop.xlane.xlu0 %320  ;;  %v322_v12 = vsub.f32 %v312_v4, %v318_v8 }
 0x126   : > { %v323_v13 = vsub.f32 %v313_v5, %v321_v9  ;;  %279 = vadd.xlane.f32.xlu1 %v278_v10 }
 0x127   : > { %v324_v14 = vsel %vm224_vm3, %v322_v12, 0.0 }
 0x128   : > { %v325_v15 = vsel %vm225_vm4, %v323_v13, 0.0  ;;  %v326_v16 = vsel %vm275_vm5, %v324_v14, 0.0 }
 0x129   : > { %v327_v18 = vsel %vm275_vm5, %v325_v15, 0.0 }
 0x12a   : > { %v328_v19 = vadd.f32 %v327_v18, %v326_v16 }
 0x12c   : > { %329 = vadd.xlane.f32.xlu0 %v328_v19 }
 0x199   : > { %v280_v20 = vpop.xlane.xlu1 %279 }
 0x19a   : > { %v281_v11 = vrot.slane %v280_v20, 4 }
 0x19c   : > { %v282_v17 = vadd.f32 %v281_v11, %v280_v20 }
 0x19e   : > { %v283_v21 = vrot.slane %v282_v17, 2 }
 0x19f   : > { %v330_v22 = vpop.xlane.xlu0 %329 }
 0x1a0   : > { %v331_v23 = vrot.slane %v330_v22, 4  ;;  %v284_v24 = vadd.f32 %v283_v21, %v282_v17 }
 0x1a2   : > { %v332_v25 = vadd.f32 %v331_v23, %v330_v22  ;;  %v285_v26 = vrot.slane %v284_v24, 1 }
 0x1a4   : > { %v333_v27 = vrot.slane %v332_v25, 2  ;;  %v286_v28 = vadd.f32 %v285_v26, %v284_v24 }
 0x1a6   : > { %v334_v29 = vadd.f32 %v333_v27, %v332_v25  ;;  %458 = vpush %v286_v28 }
 0x1a8   : > { %v335_v30 = vrot.slane %v334_v29, 1 }
 0x1aa   : > { %v336_v31 = vadd.f32 %v335_v30, %v334_v29 }
 0x1ac   : > { %460 = vpush %v336_v31 }
 0x1d7   : > { %s459_s26 = spop %458 }
 0x1d8   : > { %v339_v32 = vstv %s459_s26 }
 0x1dd   : > { %s461_s28 = spop %460 }
 0x1de   : > { %v340_v33 = vstv %s461_s28 }
 0x1df   : > { %v341_v34 = vsel %vm338_vm6, %v339_v32, %v340_v33 }
 0x1e0   : > { %342 = vst [vmem:[%s196_s24] sm:$0xff] %v341_v34 }
 0x1e1   : > { %547 = shalt.err (!%p544_p3)
}
 0x1e2   : > { %462 = dma.vmem_to_hbm [thread:$0]  (%p643_p5), %s357_s25, 128, %s359_s27, %s344_s29  }
 0x1e3 PF: > { %p468_p4 = scmp.ge.s32.totalorder %s582_s15, 2  ;;  %s370_s9 = sand.u32 1, %s570_s12  }
 0x1e4   : > { %s371_s10 = scalar_lea.sflag [#allocation3], %s370_s9 }
 0x1e5   : > { %p465_p7 = pnand %p468_p4, %p647_p6 }
 0x1e7   : > { %p466_p8 = pneg %p465_p7 }
 0x1e9   : > { %565 = dma.done.wait (%p466_p8), %s371_s10, 128  }
 0x1ea   : > { %567 = vsyncadd (%p466_p8), %s371_s10, 4294967168  ;;  %p13_p9 = scmp.ge.s32.totalorder %s630_s18, 5   ;;  %s731_s12 = smov %s574_s13 }
 0x1eb   : > { %s732_s13 = smov %s578_s14  ;;  %s733_s14 = smov %s641_s21 }
 0x1ec   : > { %s734_s15 = smov %s630_s18  ;;  %15 = sbr.rel (!%p13_p9) target bundleno = 3 (0x3), region = 73 }
 0x1f1   :  { %377 = vsyncpa [#allocation3], 1 }
 0x1f2   :  { %379 = vsyncpa [#allocation3 + $0x1], 1 }

</bundles_post_ra>
